<compile_context>
chip_gen: v6e
topology: v6e:2x2x1
jax: 0.10.0
libtpu: 0.0.40
codegen_flags: <defaults>
</compile_context>

<pallas_src>
import functools
import math

import numpy as np
import jax
import jax.numpy as jnp
from jax.experimental import pallas as pl
from jax.experimental.pallas import tpu as pltpu


# ---------------------------------------------------------------------------
# Host-side (cached) 1-D bilinear interpolation weights, matching
# nn.Upsample(size=(S, S), mode='bilinear', align_corners=False).
# Each row sums to 1, which is what makes the bias fold into kernel 1 exact.
# ---------------------------------------------------------------------------
@functools.lru_cache(maxsize=None)
def _bilinear_matrix(out_size: int, in_size: int):
    U = np.zeros((out_size, in_size), dtype=np.float32)
    scale = in_size / out_size
    for i in range(out_size):
        src = (i + 0.5) * scale - 0.5
        src = max(src, 0.0)
        x0 = min(int(np.floor(src)), in_size - 1)
        x1 = min(x0 + 1, in_size - 1)
        lam = src - x0
        U[i, x0] += 1.0 - lam
        U[i, x1] += lam
    return U


# ---------------------------------------------------------------------------
# Kernel 1: 1x1 conv applied FIRST on tokens in their native (k h w) c layout,
# with the conv bias folded in.  Per grid step (one batch element b):
#   o[g, n] = sum_k ( x[b, k, g, :] @ w_perm[k, :, n] ) + bias[n]
# GG rides on the MXU M dim, C is the lane-contraction dim (no weight broadcast).
# ---------------------------------------------------------------------------
def _conv1x1_kernel(x_ref, w_ref, b_ref, o_ref, *, num_keys):
    # x_ref: (1, K, GG, C)   w_ref: (K, C, NC)   b_ref: (1, NC) f32   o_ref: (1, GG, NC)
    acc = jnp.dot(x_ref[0, 0], w_ref[0], preferred_element_type=jnp.float32)
    for k in range(1, num_keys):                       # static, small key loop
        acc = acc + jnp.dot(x_ref[0, k], w_ref[k], preferred_element_type=jnp.float32)
    o_ref[0] = (acc + b_ref[...]).astype(o_ref.dtype)


# ---------------------------------------------------------------------------
# Kernel 2: separable bilinear upsample on mb = tile of M = B*NC feature maps.
# Input maps arrive spatially transposed, yt[m, w, h], so BOTH passes become flat
# lane-dense 2-D MXU matmuls against the same (GS, S) weight U^T:
#   height pass: (mb*GS, GS) @ (GS, S)   -> b1[(m, w), p]
#   width  pass: (mb*S,  GS) @ (GS, S)   -> out[(m, p), j]
# The only relayout is a small per-map (GS, S) swapaxes of the intermediate.
# ---------------------------------------------------------------------------
def _upsample_kernel(yt_ref, ut_ref, o_ref):
    # yt_ref: (mb, GS, GS) maps as [m, w, h]   ut_ref: (GS, S) = U^T   o_ref: (mb, S, S)
    mb, GS, _ = yt_ref.shape
    S = ut_ref.shape[1]
    ut = ut_ref[...]
    # height pass: contract the row index h (f32 accumulation on the MXU)
    b1 = jnp.dot(yt_ref[...].reshape(mb * GS, GS), ut,
                 preferred_element_type=jnp.float32)            # [(m, w), p]
    b1 = b1.reshape(mb, GS, S).astype(yt_ref.dtype)             # keep operands in compute dtype
    # put the remaining contraction dim (w) last: small (GS, S) per-map relayout
    b1t = jnp.swapaxes(b1, 1, 2)                                # (mb, S_p, GS_w)
    # width pass: contract the col index w
    out = jnp.dot(b1t.reshape(mb * S, GS), ut,
                  preferred_element_type=jnp.float32)           # [(m, p), j]
    o_ref[...] = out.reshape(mb, S, S).astype(o_ref.dtype)


# ---------------------------------------------------------------------------
# M-tile picker for the upsample: fit double-buffered in/out blocks plus f32
# intermediates in ~8 MiB (safe under v5e's 16 MiB default scoped VMEM and
# v7x's 64 MiB physical VMEM), and prefer many tiles (>= ~8 when M allows)
# so both v7x TensorCores stay balanced and the SxS writeback pipelines.
# ---------------------------------------------------------------------------
def _pick_m_tile(M, S, GS, out_itemsize, in_itemsize, vmem_budget=8 * 1024 * 1024):
    per_m = (2 * S * S * out_itemsize      # double-buffered output block
             + 2 * GS * GS * in_itemsize   # double-buffered input block
             + 2 * GS * S * 4              # height-pass intermediate (f32 + compute copy)
             + S * S * 4)                  # f32 width-pass result before the output cast
    mb_budget = max(1, vmem_budget // per_m)
    if M >= 8:
        mb_cap = min(M, mb_budget, max(1, M // 8))
    else:
        mb_cap = min(M, mb_budget, max(1, M // 2))
    mb_cap = max(1, int(mb_cap))
    return max(d for d in range(1, mb_cap + 1) if M % d == 0)


# ---------------------------------------------------------------------------
# Wrapper
# ---------------------------------------------------------------------------
def finetuner_segmentation_forward(tokens, conv_w, conv_b, *, num_keys, image_size,
                                   patch_size, compute_dtype=jnp.bfloat16,
                                   out_dtype=jnp.float32):
    """Head of FinetunerSegmentation (pool=False, deconv_decoder=False):
    rearrange -> bilinear upsample -> 1x1 conv, refactored as conv-first + separable upsample.

    tokens: [B, K*GS*GS, C] encoder output; conv_w: [NC, C*K] (or [NC, C*K, 1, 1]); conv_b: [NC].
    """
    B, T, C = tokens.shape
    GS = image_size // patch_size
    GG = GS * GS
    K = num_keys
    assert T == K * GG
    S = image_size
    conv_w = conv_w.reshape(conv_w.shape[0], -1)
    NC, CK = conv_w.shape
    assert CK == C * K
    M = B * NC

    # ---- operands (no HBM transpose of the big activation tensor) ---------------------------
    x = tokens.reshape(B, K, GG, C).astype(compute_dtype)             # pure reshape, free
    # permute the tiny 1x1-conv weight instead:  w_perm[k, c, n] = W[n, c*K + k]
    w_perm = jnp.transpose(conv_w.reshape(NC, C, K), (2, 1, 0)).astype(compute_dtype)
    bias2 = conv_b.reshape(1, NC).astype(jnp.float32)
    # one shared separable bilinear weight U^T, (GS, S), used by both upsample passes
    ut = jnp.asarray(_bilinear_matrix(S, GS).T, compute_dtype)

    c_item = jnp.dtype(compute_dtype).itemsize
    o_item = jnp.dtype(out_dtype).itemsize

    # ---- call 1: 1x1 conv first (+ bias), pipelined per-batch grid ---------------------------
    conv_cost = pl.CostEstimate(
        flops=int(2 * B * GG * C * NC * K),
        transcendentals=0,
        bytes_accessed=int((B * K * GG * C + K * C * NC + B * GG * NC) * c_item + NC * 4),
    )
    y = pl.pallas_call(
        functools.partial(_conv1x1_kernel, num_keys=K),
        out_shape=jax.ShapeDtypeStruct((B, GG, NC), compute_dtype),
        grid_spec=pltpu.PrefetchScalarGridSpec(
            num_scalar_prefetch=0,
            grid=(B,),
            in_specs=[
                pl.BlockSpec((1, K, GG, C), lambda b: (b, 0, 0, 0)),
                pl.BlockSpec((K, C, NC), lambda b: (0, 0, 0)),
                pl.BlockSpec((1, NC), lambda b: (0, 0)),
            ],
            out_specs=pl.BlockSpec((1, GG, NC), lambda b: (b, 0, 0)),
        ),
        compiler_params=pltpu.CompilerParams(dimension_semantics=("parallel",)),
        cost_estimate=conv_cost,
    )(x, w_perm, bias2)

    # ---- XLA glue on the small pre-upsample tensor: regroup to transposed (w, h) maps -------
    # yt[(b, n), w, h] = y[b, h*GS + w, n]   (only B*GG*NC elements; negligible HBM traffic)
    yt = y.reshape(B, GS, GS, NC).transpose(0, 3, 2, 1).reshape(M, GS, GS)

    # ---- call 2: separable bilinear upsample, tiled + pipelined over M = B*NC ---------------
    mb = _pick_m_tile(M, S, GS, o_item, c_item)
    up_cost = pl.CostEstimate(
        flops=int(2 * M * GS * S * (GS + S)),
        transcendentals=0,
        bytes_accessed=int(M * GG * c_item + GS * S * c_item + M * S * S * o_item),
    )
    out = pl.pallas_call(
        _upsample_kernel,
        out_shape=jax.ShapeDtypeStruct((M, S, S), out_dtype),
        grid_spec=pltpu.PrefetchScalarGridSpec(
            num_scalar_prefetch=0,
            grid=(M // mb,),
            in_specs=[
                pl.BlockSpec((mb, GS, GS), lambda i: (i, 0, 0)),
                pl.BlockSpec((GS, S), lambda i: (0, 0)),
            ],
            out_specs=pl.BlockSpec((mb, S, S), lambda i: (i, 0, 0)),
        ),
        compiler_params=pltpu.CompilerParams(dimension_semantics=("parallel",)),
        cost_estimate=up_cost,
    )(yt, ut)

    return out.reshape(B, NC, S, S)                       # free reshape to NCHW


if __name__ == "__main__":
    key = jax.random.PRNGKey(0)
    B = 2                      # batch
    K = 2                      # len(keys) == configs['in_channels']
    C = 32                     # encoder.mlp_head.in_features
    image_size = 16            # configs['image_size']
    patch_size = 4             # configs['finetuning_patch_size']
    num_classes = 3            # configs['num_classes']
    GS = image_size // patch_size
    CK = C * K

    k1, k2, k3 = jax.random.split(key, 3)
    # TODO(synk): self.model (the external ViT encoder) has no definition here; deterministic
    # random tokens stand in for its pool=False output of shape [B, K*GS*GS, C].
    tokens = jax.random.normal(k1, (B, K * GS * GS, C), dtype=jnp.float32)
    bound = 1.0 / math.sqrt(CK)
    conv_w = jax.random.uniform(k2, (num_classes, CK), minval=-bound, maxval=bound,
                                dtype=jnp.float32)
    conv_b = jax.random.uniform(k3, (num_classes,), minval=-bound, maxval=bound,
                                dtype=jnp.float32)
    # Round test data to bf16-representable values so both precision paths can be compared
    # against the same float64 host reference.
    tokens = tokens.astype(jnp.bfloat16).astype(jnp.float32)
    conv_w = conv_w.astype(jnp.bfloat16).astype(jnp.float32)
    conv_b = conv_b.astype(jnp.bfloat16).astype(jnp.float32)

    fwd_base = functools.partial(finetuner_segmentation_forward, num_keys=K,
                                 image_size=image_size, patch_size=patch_size)
    fwd_f32 = jax.jit(functools.partial(fwd_base, compute_dtype=jnp.float32,
                                        out_dtype=jnp.float32))
    fwd_bf16 = jax.jit(functools.partial(fwd_base, compute_dtype=jnp.bfloat16,
                                         out_dtype=jnp.bfloat16))

    out_f32 = jax.block_until_ready(fwd_f32(tokens, conv_w, conv_b))
    out_bf16 = jax.block_until_ready(fwd_bf16(tokens, conv_w, conv_b))

    # float64 host reference, faithful to the original module order:
    # rearrange -> bilinear upsample (align_corners=False) -> 1x1 conv + bias.
    U64 = _bilinear_matrix(image_size, GS).astype(np.float64)
    t64 = np.asarray(tokens, np.float64)
    xr = t64.reshape(B, K, GS, GS, C).transpose(0, 4, 1, 2, 3).reshape(B, CK, GS, GS)
    up = np.einsum('ip,bmpq,jq->bmij', U64, xr, U64)
    ref = np.einsum('nm,bmij->bnij', np.asarray(conv_w, np.float64), up)
    ref = ref + np.asarray(conv_b, np.float64)[None, :, None, None]

    assert out_f32.shape == (B, num_classes, image_size, image_size)
    assert out_bf16.shape == (B, num_classes, image_size, image_size)
    np.testing.assert_allclose(np.asarray(out_f32), ref, rtol=1e-4, atol=1e-4)
    np.testing.assert_allclose(np.asarray(out_bf16, np.float64), ref, rtol=2e-2, atol=2e-2)
    print("KERNEL_OK")
</pallas_src>

<mosaic_0001>
module attributes {stable_mosaic.version = 11 : i64} {
  func.func @_conv1x1_kernel(%arg0: i32, %arg1: memref<1x2x16x32xf32, #tpu.memory_space<vmem>>, %arg2: memref<2x32x3xf32, #tpu.memory_space<vmem>>, %arg3: memref<1x3xf32, #tpu.memory_space<vmem>>, %arg4: memref<1x16x3xf32, #tpu.memory_space<vmem>>) attributes {dimension_semantics = [#tpu.dimension_semantics<parallel>], iteration_bounds = array<i64: 2>, scalar_prefetch = 0 : i64, scratch_operands = 0 : i64, tpu.core_type = #tpu.core_type<tc>, window_params = [{transform_indices = @transform_0, window_bounds = array<i64: 1, 2, 16, 32>}, {pipeline_mode = #tpu.pipeline_mode<synchronous>, transform_indices = @transform_1, window_bounds = array<i64: 2, 32, 3>}, {pipeline_mode = #tpu.pipeline_mode<synchronous>, transform_indices = @transform_2, window_bounds = array<i64: 1, 3>}, {transform_indices = @transform_3, window_bounds = array<i64: 1, 16, 3>}]} {
    %c0 = arith.constant 0 : index
    %c0_0 = arith.constant 0 : index
    %c0_1 = arith.constant 0 : index
    %c0_2 = arith.constant 0 : index
    %0 = vector.load %arg1[%c0, %c0_0, %c0_1, %c0_2] : memref<1x2x16x32xf32, #tpu.memory_space<vmem>>, vector<1x1x16x32xf32>
    %1 = vector.shape_cast %0 : vector<1x1x16x32xf32> to vector<16x32xf32>
    %c0_3 = arith.constant 0 : index
    %c0_4 = arith.constant 0 : index
    %c0_5 = arith.constant 0 : index
    %2 = vector.load %arg2[%c0_3, %c0_4, %c0_5] : memref<2x32x3xf32, #tpu.memory_space<vmem>>, vector<1x32x3xf32>
    %3 = vector.shape_cast %2 : vector<1x32x3xf32> to vector<32x3xf32>
    %cst = arith.constant dense<0.000000e+00> : vector<16x3xf32>
    %4 = tpu.matmul %1, %3, %cst {dimension_numbers = #tpu.dot_dimension_numbers<[1], [0], [0], [1], [0, 0, 1, 1], [], []>} : vector<16x32xf32>, vector<32x3xf32>, vector<16x3xf32> -> vector<16x3xf32>
    %c0_6 = arith.constant 0 : index
    %c1 = arith.constant 1 : index
    %c0_7 = arith.constant 0 : index
    %c0_8 = arith.constant 0 : index
    %5 = vector.load %arg1[%c0_6, %c1, %c0_7, %c0_8] : memref<1x2x16x32xf32, #tpu.memory_space<vmem>>, vector<1x1x16x32xf32>
    %6 = vector.shape_cast %5 : vector<1x1x16x32xf32> to vector<16x32xf32>
    %c1_9 = arith.constant 1 : index
    %c0_10 = arith.constant 0 : index
    %c0_11 = arith.constant 0 : index
    %7 = vector.load %arg2[%c1_9, %c0_10, %c0_11] : memref<2x32x3xf32, #tpu.memory_space<vmem>>, vector<1x32x3xf32>
    %8 = vector.shape_cast %7 : vector<1x32x3xf32> to vector<32x3xf32>
    %cst_12 = arith.constant dense<0.000000e+00> : vector<16x3xf32>
    %9 = tpu.matmul %6, %8, %cst_12 {dimension_numbers = #tpu.dot_dimension_numbers<[1], [0], [0], [1], [0, 0, 1, 1], [], []>} : vector<16x32xf32>, vector<32x3xf32>, vector<16x3xf32> -> vector<16x3xf32>
    %10 = arith.addf %4, %9 : vector<16x3xf32>
    %c0_13 = arith.constant 0 : index
    %c0_14 = arith.constant 0 : index
    %11 = vector.load %arg3[%c0_13, %c0_14] : memref<1x3xf32, #tpu.memory_space<vmem>>, vector<1x3xf32>
    %12 = vector.broadcast %11 : vector<1x3xf32> to vector<16x3xf32>
    %13 = arith.addf %10, %12 : vector<16x3xf32>
    %c0_15 = arith.constant 0 : index
    %c0_16 = arith.constant 0 : index
    %c0_17 = arith.constant 0 : index
    %14 = vector.load %arg4[%c0_15, %c0_16, %c0_17] : memref<1x16x3xf32, #tpu.memory_space<vmem>>, vector<1x16x3xf32>
    %15 = vector.shape_cast %14 : vector<1x16x3xf32> to vector<16x3xf32>
    %16 = vector.shape_cast %13 : vector<16x3xf32> to vector<1x16x3xf32>
    tpu.vector_store %arg4[%c0_15, %c0_16, %c0_17], %16 {strides = array<i32>} : memref<1x16x3xf32, #tpu.memory_space<vmem>>, vector<1x16x3xf32>,
    return
  }
  func.func @transform_0(%arg0: i32) -> (i32, i32, i32, i32) {
    %c0_i32 = arith.constant 0 : i32
    %c0_i32_0 = arith.constant 0 : i32
    %c0_i32_1 = arith.constant 0 : i32
    %c0_i32_2 = arith.constant 0 : i32
    return %arg0, %c0_i32, %c0_i32_0, %c0_i32_1 : i32, i32, i32, i32
  }
  func.func @transform_1(%arg0: i32) -> (i32, i32, i32) {
    %c0_i32 = arith.constant 0 : i32
    %c0_i32_0 = arith.constant 0 : i32
    %c0_i32_1 = arith.constant 0 : i32
    %c0_i32_2 = arith.constant 0 : i32
    return %c0_i32, %c0_i32_0, %c0_i32_1 : i32, i32, i32
  }
  func.func @transform_2(%arg0: i32) -> (i32, i32) {
    %c0_i32 = arith.constant 0 : i32
    %c0_i32_0 = arith.constant 0 : i32
    %c0_i32_1 = arith.constant 0 : i32
    return %c0_i32, %c0_i32_0 : i32, i32
  }
  func.func @transform_3(%arg0: i32) -> (i32, i32, i32) {
    %c0_i32 = arith.constant 0 : i32
    %c0_i32_0 = arith.constant 0 : i32
    %c0_i32_1 = arith.constant 0 : i32
    return %arg0, %c0_i32, %c0_i32_0 : i32, i32, i32
  }
}

module attributes {stable_mosaic.version = 11 : i64} {
  func.func @_upsample_kernel(%arg0: i32, %arg1: memref<3x4x4xf32, #tpu.memory_space<vmem>>, %arg2: memref<4x16xf32, #tpu.memory_space<vmem>>, %arg3: memref<3x16x16xf32, #tpu.memory_space<vmem>>) attributes {dimension_semantics = [#tpu.dimension_semantics<parallel>], iteration_bounds = array<i64: 2>, scalar_prefetch = 0 : i64, scratch_operands = 0 : i64, tpu.core_type = #tpu.core_type<tc>, window_params = [{transform_indices = @transform_0, window_bounds = array<i64: 3, 4, 4>}, {pipeline_mode = #tpu.pipeline_mode<synchronous>, transform_indices = @transform_1, window_bounds = array<i64: 4, 16>}, {transform_indices = @transform_2, window_bounds = array<i64: 3, 16, 16>}]} {
    %c0 = arith.constant 0 : index
    %c0_0 = arith.constant 0 : index
    %0 = vector.load %arg2[%c0, %c0_0] : memref<4x16xf32, #tpu.memory_space<vmem>>, vector<4x16xf32>
    %c0_1 = arith.constant 0 : index
    %c0_2 = arith.constant 0 : index
    %c0_3 = arith.constant 0 : index
    %1 = vector.load %arg1[%c0_1, %c0_2, %c0_3] : memref<3x4x4xf32, #tpu.memory_space<vmem>>, vector<3x4x4xf32>
    %2 = vector.shape_cast %1 : vector<3x4x4xf32> to vector<12x4xf32>
    %cst = arith.constant dense<0.000000e+00> : vector<12x16xf32>
    %3 = tpu.matmul %2, %0, %cst {dimension_numbers = #tpu.dot_dimension_numbers<[1], [0], [0], [1], [0, 0, 1, 1], [], []>} : vector<12x4xf32>, vector<4x16xf32>, vector<12x16xf32> -> vector<12x16xf32>
    %4 = vector.shape_cast %3 : vector<12x16xf32> to vector<3x4x16xf32>
    %5 = tpu.transpose %4, [0, 2, 1] : vector<3x4x16xf32> -> vector<3x16x4xf32>
    %6 = vector.shape_cast %5 : vector<3x16x4xf32> to vector<48x4xf32>
    %cst_4 = arith.constant dense<0.000000e+00> : vector<48x16xf32>
    %7 = tpu.matmul %6, %0, %cst_4 {dimension_numbers = #tpu.dot_dimension_numbers<[1], [0], [0], [1], [0, 0, 1, 1], [], []>} : vector<48x4xf32>, vector<4x16xf32>, vector<48x16xf32> -> vector<48x16xf32>
    %8 = vector.shape_cast %7 : vector<48x16xf32> to vector<3x16x16xf32>
    %c0_5 = arith.constant 0 : index
    %c0_6 = arith.constant 0 : index
    %c0_7 = arith.constant 0 : index
    %9 = vector.load %arg3[%c0_5, %c0_6, %c0_7] : memref<3x16x16xf32, #tpu.memory_space<vmem>>, vector<3x16x16xf32>
    tpu.vector_store %arg3[%c0_5, %c0_6, %c0_7], %8 {strides = array<i32>} : memref<3x16x16xf32, #tpu.memory_space<vmem>>, vector<3x16x16xf32>,
    return
  }
  func.func @transform_0(%arg0: i32) -> (i32, i32, i32) {
    %c0_i32 = arith.constant 0 : i32
    %c0_i32_0 = arith.constant 0 : i32
    %c0_i32_1 = arith.constant 0 : i32
    return %arg0, %c0_i32, %c0_i32_0 : i32, i32, i32
  }
  func.func @transform_1(%arg0: i32) -> (i32, i32) {
    %c0_i32 = arith.constant 0 : i32
    %c0_i32_0 = arith.constant 0 : i32
    %c0_i32_1 = arith.constant 0 : i32
    return %c0_i32, %c0_i32_0 : i32, i32
  }
  func.func @transform_2(%arg0: i32) -> (i32, i32, i32) {
    %c0_i32 = arith.constant 0 : i32
    %c0_i32_0 = arith.constant 0 : i32
    %c0_i32_1 = arith.constant 0 : i32
    return %arg0, %c0_i32, %c0_i32_0 : i32, i32, i32
  }
}

</mosaic_0001>

<bundles_post_ra>
// kernel: finetuner_segmentation_forward.2
= control target key start
LH: loop header
LB: loop body
LE: loop exit
PB: predicated region body
PF: predicated region fallthrough
CT: control target
= control target key end

     0   :  { %s509_s12 = smov 0   ;;  %s557_s0 = inlined_call_operand.vmem [shape: f32[2,2,16,32], index: 0, kind: input, shape index: {}]   ;;  %s558_s1 = inlined_call_operand.vmem [shape: f32[2,32,3], index: 1, kind: input, shape index: {}]   ;;  %s559_s2 = inlined_call_operand.vmem [shape: f32[1,3], index: 2, kind: input, shape index: {}]   ;;  %s560_s3 = inlined_call_operand.vmem [shape: f32[2,16,3], index: 3, kind: output, shape index: {}]  }
   0x1 LB: > { %s415_s13 = sadd.s32 4294967295, %s487_s12   ;;  %p419_p0 = scmp.ge.s32.totalorder %s487_s12, 1  ;;  %s487_s12 = sphi %s509_s12, %s13_s12  }
   0x2   : > { %p137_p1 = scmp.lt.s32.totalorder %s487_s12, 3 }
   0x4   : > { %p138_p2 = pnand %p419_p0, %p137_p1 }
   0x5   : > { %p161_p3 = scmp.lt.s32.totalorder (!%p138_p2), %s415_s13, 1 }
   0x6   : > { %141 = sbr.rel (%p138_p2) target bundleno = 222 (0xde), region = 32 }
   0xb   : > { %v429_v0 = vld [vmem:[%s558_s1 + $0x38] sm:$0xff]  ;;  %v428_v2 = vld [vmem:[%s558_s1 + $0x30] sm:$0xff]  ;;  %v427_v4 = vld [vmem:[%s558_s1 + $0x28] sm:$0xff]  ;;  %s562_s13 = smov (!%p161_p3, %s415_s13), 1  ;;  %vm185_vm0 = vcmask 261120   ;;  %vm357_vm1 = vcmask 23552  }
   0xc   : > { %v176_v1 = vld [vmem:[%s558_s1 + $0x18] sm:$0xff]  ;;  %451 = vmatprep.subr.mxu0 %v429_v0  ;;  %v175_v3 = vld [vmem:[%s558_s1 + $0x10] sm:$0xff]  ;;  %v174_v5 = vld [vmem:[%s558_s1 + $0x8] sm:$0xff]  ;;  %s437_s30 = sshll.u32 %s562_s13, 5  ;;  %s438_s7 = sshll.u32 %s562_s13, 4 }
   0xd   : > { %462 = vmatprep.subr.mxu1 %v176_v1  ;;  %452 = vmatpush3.msra.mxu0 %v429_v0  ;;  %v426_v6 = vld [vmem:[%s558_s1 + $0x20] sm:$0xff]  ;;  %s165_s6 = scalar_lea.vmem %s557_s0, %s437_s30  ;;  %s170_s14 = scalar_lea.vmem %s560_s3, %s438_s7 }
   0xe   : > { %463 = vmatpush3.msra.mxu1 %v176_v1  ;;  %453 = vmatprep.subr.mxu0 %v428_v2  ;;  %v173_v7 = vld [vmem:[%s558_s1] sm:$0xff]  ;;  %v424_v8 = vld [vmem:[%s165_s6 + $0x10] sm:$0xff]  ;;  %v425_v10 = vld [vmem:[%s165_s6 + $0x18] sm:$0xff] }
   0xf   : > { %464 = vmatprep.subr.mxu1 %v175_v3  ;;  %454 = vmatpush3.msra.mxu0 %v428_v2  ;;  %v171_v9 = vld [vmem:[%s165_s6] sm:$0xff]  ;;  %v172_v11 = vld [vmem:[%s165_s6 + $0x8] sm:$0xff] }
  0x10   : > { %465 = vmatpush3.msra.mxu1 %v175_v3  ;;  %455 = vmatprep.subr.mxu0 %v427_v4  ;;  %v434_v14 = vld [vmem:[%s559_s2] ss:$0 sm:$0xff] }
  0x11   : > { %466 = vmatprep.subr.mxu1 %v174_v5  ;;  %456 = vmatpush3.msra.mxu0 %v427_v4 }
  0x12   : > { %467 = vmatpush3.msra.mxu1 %v174_v5  ;;  %457 = vmatprep.subr.mxu0 %v426_v6 }
  0x13   : > { %468 = vmatprep.subr.mxu1 %v173_v7  ;;  %458 = vmatpush3.msra.mxu0 %v426_v6 }
  0x14   : > { %459 = vmatprep.mubr.msk.f32.mxu0 %vm185_vm0, %v424_v8  ;;  %469 = vmatpush3.msra.mxu1 %v173_v7 }
  0x15   : > { %470 = vmatprep.mubr.msk.f32.mxu1 %vm185_vm0, %v171_v9  ;;  %460 = vmatmul.mubr.msk.f32.vlgmr.msra.gmra.mxu0 %vm185_vm0, %v425_v10 }
  0x16   : > { %471 = vmatmul.mubr.msk.f32.vlgmr.msra.gmra.mxu1 %vm185_vm0, %v172_v11 }
  0xd5   : > { %v461_v12 = vpop.f32.mrf.mxu0 }
  0xd6   : > { %v472_v13 = vpop.f32.mrf.mxu1 }
  0xd7   : > { %v345_v15 = vadd.f32 %v472_v13, %v461_v12  ;;  %v258_v16 = vpop.f32.mrf.mxu0 }
  0xd8   : > { %v339_v17 = vpop.f32.mrf.mxu1 }
  0xd9   : > { %v356_v18 = vadd.f32 %v434_v14, %v345_v15  ;;  %v340_v19 = vadd.f32 %v339_v17, %v258_v16 }
  0xdb   : > { %359 = vst.msk [vmem:[%s170_s14 + $0x8] sm:$0xff] %vm357_vm1, %v356_v18  ;;  %v355_v20 = vadd.f32 %v434_v14, %v340_v19 }
  0xdd   : > { %358 = vst.msk [vmem:[%s170_s14] sm:$0xff] %vm357_vm1, %v355_v20 }
  0xde PF: > { %s13_s12 = sadd.s32 1, %s487_s12  }
  0xdf   : > { %p10_p4 = scmp.ge.s32.totalorder %s13_s12, 4  }
  0xe1   :  { %12 = sbr.rel (!%p10_p4) target bundleno = 1 (0x1), region = 64 }

// kernel: finetuner_segmentation_forward.3
= control target key start
LH: loop header
LB: loop body
LE: loop exit
PB: predicated region body
PF: predicated region fallthrough
CT: control target
= control target key end

     0   :  { %7 = vsyncpa [#allocation3], 0  ;;  %s831_s0 = inlined_call_operand.vmem [shape: f32[6,4,4], index: 0, kind: input, shape index: {}]   ;;  %s832_s1 = inlined_call_operand.vmem [shape: f32[4,16], index: 1, kind: input, shape index: {}]   ;;  %s833_s2 = inlined_call_operand.hbm [shape: f32[6,16,16], index: 2, kind: output, shape index: {}]  }
   0x1   :  { %9 = vsyncpa [#allocation3 + $0x1], 0  ;;  %s707_s9 = smov 0   ;;  %s709_s10 = smov 0  }
   0x2   :  { %s711_s11 = smov 0   ;;  %s713_s12 = smov 0  }
   0x3 LB: > { %s728_s13 = sadd.s32 4294967295, %s687_s12   ;;  %s533_s14 = sadd.s32 4294967294, %s687_s12   ;;  %s687_s12 = sphi %s713_s12, %s839_s12   ;;  %s683_s11 = sphi %s711_s11, %s838_s11   ;;  %s679_s10 = sphi %s709_s10, %s837_s10   ;;  %s675_s9 = sphi %s707_s9, %s836_s9  }
   0x4   : > { %s732_s15 = sadd.s32 1, %s687_s12   ;;  %s69_s16 = sadd.s32 1, %s683_s11 }
   0x5   : > { %s66_s17 = ssub.s32 %s687_s12, %s732_s15  ;;  %p79_p0 = scmp.ne.s32.totalorder %s683_s11, %s679_s10 }
   0x6   : > { %p67_p1 = scmp.eq.s32.totalorder %s66_s17, 0  ;;  %p80_p2 = scmp.eq.s32.totalorder %s728_s13, 1 }
   0x7   : > { %p85_p3 = scmp.ne.s32.totalorder %s679_s10, %s675_s9  ;;  %p86_p4 = scmp.eq.s32.totalorder %s533_s14, 1 }
   0x8   : > { %s743_s18 = scalar_select %p67_p1, %s683_s11, %s69_s16  }
   0x9   : > { %p745_p5 = por %p80_p2, %p79_p0  ;;  %p749_p6 = por %p86_p4, %p85_p3 }
   0xa   : > { %p536_p7 = scmp.ge.s32.totalorder %s687_s12, 1  ;;  %p116_p8 = scmp.lt.s32.totalorder %s687_s12, 3 }
   0xc   : > { %p117_p9 = pnand %p536_p7, %p116_p8 }
   0xd   : > { %s138_s23 = smul.u32 (!%p117_p9), 3, %s728_s13  ;;  %s135_s28 = sand.u32 (!%p117_p9), 1, %s679_s10  }
   0xe   : > { %120 = sbr.rel (%p117_p9) target bundleno = 567 (0x237), region = 28  ;;  %s791_s8 = scalar_lea.sflag (!%p117_p9), [#allocation3], %s135_s28 }
   0xf   : > { %p139_p10 = scmp.lt.s32.totalorder (!%p117_p9), %s138_s23, 5  ;;  %s583_s29 = smul.u32 (!%p117_p9), 48, %s135_s28 }
  0x10   : > { %s554_s3 = smul.u32 (!%p117_p9), 768, %s728_s13  ;;  %s689_s14 = smov (!%p117_p9), [#allocation2]  }
  0x11   : > { %s137_s30 = scalar_lea.vmem (!%p117_p9), [#allocation2], %s583_s29  ;;  %s631_s16 = sshll.u32 (!%p117_p9), %s689_s14, 4  ;;  %s632_s16 = int_to_ptr.vmem [resolvable:$false] %s631_s16 }
  0x12   : > { %s471_s4 = sshll.u32 (!%p117_p9), %s137_s30, 4  ;;  %s787_s7 = scalar_lea.hbm (!%p117_p9), %s833_s2, %s554_s3  ;;  %s782_s4 = int_to_ptr.vmem [resolvable:$true] %s471_s4 }
  0x13   : > { %v145_v0 = vld [vmem:[%s832_s1] sm:$0xf]  ;;  %vm158_vm0 = vcmask 1043456   ;;  %s841_s23 = smov (!%p139_p10, %s138_s23), 5  ;;  %vm153_vm1 = vcmask 31744   ;;  %vm449_vm2 = vcmask 130048   ;;  %p634_p0 = scmp.lt.s32.totalorder %s782_s4, %s632_s16 }
  0x14   : > { %565 = vmatprep.subr.msk.mxu0 %vm158_vm0, %v145_v0  ;;  %581 = vmatprep.subr.msk.mxu1 %vm158_vm0, %v145_v0  ;;  %s537_s24 = sshll.u32 %s841_s23, 2  ;;  %s627_s13 = scalar_lea.vmem %s782_s4, 768 }
  0x15   : > { %566 = vmatpush3.msk.msra.mxu0 %vm158_vm0, %v145_v0  ;;  %582 = vmatpush3.msk.msra.mxu1 %vm158_vm0, %v145_v0  ;;  %s142_s27 = scalar_lea.vmem %s831_s0, %s537_s24  ;;  %p628_p11 = scmp.ne.s32.totalorder %s782_s4, %s627_s13 }
  0x16   : > { %570 = vmatprep.subr.msk.mxu0 %vm158_vm0, %v145_v0  ;;  %v626_v1 = vld [vmem:[%s142_s27] sm:$0xff]   ;;  %v148_v2 = vld [vmem:[%s142_s27 + $0x8] sm:$0xf]  ;;  %s633_s17 = scalar_lea.vmem %s632_s16, 1536 }
  0x17   : > { %567 = vmatprep.mubr.msk.f32.mxu0 %vm153_vm1, %v626_v1  ;;  %p629_p12 = pnand %p628_p11, %p745_p5  ;;  %p635_p1 = scmp.lt.s32.totalorder %s633_s17, %s627_s13 }
  0x18   : > { %568 = vmatmul.mubr.msk.f32.vlgmr.msra.gmra.mxu0 %vm153_vm1, %v148_v2 }
  0x19   : > { %571 = vmatpush3.msk.msra.mxu0 %vm158_vm0, %v145_v0  ;;  %p630_p13 = pneg %p629_p12  ;;  %p636_p2 = por %p635_p1, %p634_p0 }
  0x1b   : > { %p637_p3 = pnand %p636_p2, %p630_p13 }
  0xd8   : > { %v569_v3 = vpop.f32.mrf.mxu0 }
  0xd9   : > { %304 = vxpose.xlu1.b32.start.end [1/1] (short) (narrow) %v569_v3, 16 }
  0xda   : > { %v228_v4 = vpop.f32.mrf.mxu0 }
  0xdb   : > { %v238_v5 = vcombine.high %v228_v4, %v228_v4 }
  0xdd   : > { %272 = vxpose.xlu0.b32.start.end [1/1] (short) (narrow) %v238_v5, 16 }
  0xe2   : > { %240 = vxpose.xlu0.b32.start.end [1/1] (short) (narrow) %v228_v4, 16 }
 0x155   : > { %v320_v7 = vpop.trf.xlu1 }
 0x159   : > { %v288_v6 = vpop.trf.xlu0  ;;  %v321_v9 = vpop.trf.xlu1 }
 0x15a   : > { %575 = vmatprep.mubr.msk.f32.mxu1 %vm153_vm1, %v288_v6 }
 0x15d   : > { %v289_v8 = vpop.trf.xlu0 }
 0x15e   : > { %576 = vmatmul.mubr.msk.f32.vlgmr.msra.gmra.mxu1 %vm153_vm1, %v289_v8 }
 0x15f   : > { %578 = vmatprep.mubr.msk.f32.mxu1 %vm153_vm1, %v320_v7 }
 0x161   : > { %v256_v10 = vpop.trf.xlu0 }
 0x162   : > { %572 = vmatprep.mubr.msk.f32.mxu0 %vm153_vm1, %v256_v10  ;;  %579 = vmatmul.mubr.msk.f32.gmra.mxu1 %vm153_vm1, %v321_v9 }
 0x165   : > { %v257_v11 = vpop.trf.xlu0 }
 0x166   : > { %573 = vmatmul.mubr.msk.f32.vlgmr.msra.gmra.mxu0 %vm153_vm1, %v257_v11 }
 0x21e   : > { %v577_v12 = vpop.f32.mrf.mxu1 }
 0x21f   : > { %453 = vst.msk [vmem:[%s137_s30 + $0x18] sm:$0xff] %vm449_vm2, %v577_v12 }
 0x220   : > { %v430_v13 = vpop.f32.mrf.mxu1 }
 0x221   : > { %452 = vst.msk [vmem:[%s137_s30 + $0x10] sm:$0xff] %vm449_vm2, %v430_v13 }
 0x222   : > { %v580_v14 = vpop.f32.mrf.mxu1 }
 0x223   : > { %455 = vst.msk [vmem:[%s137_s30 + $0x28] sm:$0xff] %vm449_vm2, %v580_v14 }
 0x224   : > { %v440_v15 = vpop.f32.mrf.mxu1 }
 0x225   : > { %454 = vst.msk [vmem:[%s137_s30 + $0x20] sm:$0xff] %vm449_vm2, %v440_v15 }
 0x226   : > { %v574_v16 = vpop.f32.mrf.mxu0 }
 0x227   : > { %451 = vst.msk [vmem:[%s137_s30 + $0x8] sm:$0xff] %vm449_vm2, %v574_v16 }
 0x228   : > { %v420_v17 = vpop.f32.mrf.mxu0 }
 0x229   : > { %450 = vst.msk [vmem:[%s137_s30] sm:$0xff] %vm449_vm2, %v420_v17 }
 0x22a   : > { %640 = shalt.err (!%p637_p3)
}
 0x22b   : > { %s641_s21 = scalar_lea.hbm %s787_s7, 768  ;;  %s645_s24 = scalar_lea.hbm %s833_s2, 1536 }
 0x22c   : > { %p642_p4 = scmp.ne.s32.totalorder %s787_s7, %s641_s21  ;;  %p646_p9 = scmp.lt.s32.totalorder %s787_s7, %s833_s2 }
 0x22d   : > { %p647_p10 = scmp.lt.s32.totalorder %s645_s24, %s641_s21 }
 0x22e   : > { %p643_p7 = pnand %p642_p4, %p745_p5 }
 0x22f   : > { %p648_p11 = por %p647_p10, %p646_p9 }
 0x230   : > { %p644_p8 = pneg %p643_p7 }
 0x232   : > { %p649_p12 = pnand %p648_p11, %p644_p8 }
 0x234   : > { %652 = shalt.err (!%p649_p12)
}
 0x235   : > { %s690_s27 = smov 128   ;;  %s691_s28 = smov 8  }
 0x236   : > { %584 = dma.vmem_to_hbm [thread:$0]  (%p745_p5), %s782_s4, 768, %s787_s7, %s791_s8, %s690_s27, %s690_s27, %s691_s28  }
 0x237 PF: > { %p590_p13 = scmp.ge.s32.totalorder %s687_s12, 2  ;;  %s486_s29 = sand.u32 1, %s675_s9  }
 0x238   : > { %s487_s30 = scalar_lea.sflag [#allocation3], %s486_s29 }
 0x239   : > { %p587_p0 = pnand %p590_p13, %p749_p6 }
 0x23b   : > { %p588_p1 = pneg %p587_p0 }
 0x23d   : > { %670 = dma.done.wait (%p588_p1), %s487_s30, 768  }
 0x23e   : > { %672 = vsyncadd (%p588_p1), %s487_s30, 4294966528  ;;  %p12_p2 = scmp.ge.s32.totalorder %s732_s15, 4   ;;  %s836_s9 = smov %s679_s10 }
 0x23f   : > { %s837_s10 = smov %s683_s11  ;;  %s838_s11 = smov %s743_s18 }
 0x240   : > { %s839_s12 = smov %s732_s15  ;;  %14 = sbr.rel (!%p12_p2) target bundleno = 3 (0x3), region = 63 }
 0x245   :  { %492 = vsyncpa [#allocation3], 1 }
 0x246   :  { %494 = vsyncpa [#allocation3 + $0x1], 1 }

</bundles_post_ra>
